<compile_context>
chip_gen: v7x
topology: tpu7x:2x2x1
jax: 0.10.0
libtpu: 0.0.40
codegen_flags: <defaults>
</compile_context>

<pallas_src>
import functools

import jax
import jax.numpy as jnp
from jax.experimental import pallas as pl
from jax.experimental.pallas import tpu as pltpu


def _round_up(x, m):
    return ((x + m - 1) // m) * m


@functools.lru_cache(maxsize=None)
def _vmem_capacity_bytes():
    """Per-core VMEM capacity; conservative 64 MiB (v7x) fallback."""
    try:
        cap = getattr(pltpu.get_tpu_info(), "vmem_capacity_bytes", None)
        if cap:
            return int(min(int(cap), 128 << 20))
    except Exception:
        pass
    return 64 << 20


def _select_tiles(M, D_in, d_model, act_bytes, out_bytes, vmem_cap):
    """Pick (tm, tn) and return the estimated VMEM working set."""
    Dp = _round_up(D_in, 128)     # lane-padded sizes for the VMEM estimate
    Np = _round_up(d_model, 128)
    budget = int(vmem_cap * 0.80)  # headroom for compiler-internal scratch

    def working_set(tm, tn_pad):
        act = 2 * 2 * tm * Dp * act_bytes     # resid + x, double-buffered
        gate = tm * Dp * 2                     # bf16 gate scratch (1 copy)
        wt = 2 * Dp * tn_pad * 2               # weight double-buffer, bf16
        out = 2 * tm * tn_pad * out_bytes      # output double-buffer
        bias = 2 * 8 * tn_pad * 4
        return act + gate + wt + out + bias

    tm_cap = _round_up(M, 16)                  # bf16 sublane tile is (16, 128)
    tm_cands = [t for t in (1024, 512, 256, 128, 64, 32, 16) if t <= tm_cap]
    if not tm_cands:
        tm_cands = [tm_cap]

    # Prefer a fully resident weight (DMA'd once per kernel) at the largest
    # affordable row tile.
    for tm in tm_cands:
        ws = working_set(tm, Np)
        if ws <= budget:
            return tm, d_model, ws

    # Otherwise N-tile the weight; prefer the largest row tile so the weight
    # stream's arithmetic intensity (~tm flops/byte) stays above HBM balance.
    for tm in tm_cands:
        for tn in (512, 256, 128):
            ws = working_set(tm, tn)
            if ws <= budget:
                return tm, tn, ws

    # TODO(synk): K-axis reduction tiling for very large D_in.
    return tm_cands[-1], 128, working_set(tm_cands[-1], 128)


def _gal_kernel(resid_ref, x_ref, w_ref, b_ref, o_ref, h_ref):
    # Gate hoisted out of the inner (output-feature) loop: the (i, 0)
    # activation block is identical for every j, so compute silu(r)+x once
    # per row tile and reuse the bf16 scratch for all N tiles.
    @pl.when(pl.program_id(1) == 0)
    def _():
        r = resid_ref[...].astype(jnp.float32)   # f32 elementwise (VPU/EUP)
        xv = x_ref[...].astype(jnp.float32)
        h = jax.nn.sigmoid(r) * r + xv
        h_ref[...] = h.astype(jnp.bfloat16)      # MXU operand dtype

    acc = jnp.dot(h_ref[...], w_ref[...], preferred_element_type=jnp.float32)
    o_ref[...] = (acc + b_ref[...]).astype(o_ref.dtype)


def prepare_gal_params(w, b):
    """One-time parameter prep: bf16 weight (MXU dtype), f32 row bias."""
    return w.astype(jnp.bfloat16), b.astype(jnp.float32).reshape(1, -1)


@jax.jit
def gal_forward(resid, x, w, b):
    """resid, x: (B, S, D_in); w: (D_in, d_model); b: (d_model,) or (1, d_model)."""
    B, S, D_in = resid.shape
    d_model = w.shape[-1]
    M = B * S

    # No-ops if prepare_gal_params was used (the recommended path).
    w = w if w.dtype == jnp.bfloat16 else w.astype(jnp.bfloat16)
    b2d = b.reshape(1, d_model).astype(jnp.float32)

    # Plain reshapes of contiguous arrays -- no padded HBM copies.
    resid2d = resid.reshape(M, D_in)
    x2d = x.reshape(M, D_in)

    out_dtype = resid.dtype
    act_bytes = jnp.dtype(resid.dtype).itemsize
    out_bytes = jnp.dtype(out_dtype).itemsize
    vmem_cap = _vmem_capacity_bytes()
    tm, tn, ws = _select_tiles(M, D_in, d_model, act_bytes, out_bytes, vmem_cap)

    vmem_limit = int(min(vmem_cap, max(ws * 3 // 2 + (2 << 20), 32 << 20)))

    grid = (pl.cdiv(M, tm), pl.cdiv(d_model, tn))

    out2d = pl.pallas_call(
        _gal_kernel,
        out_shape=jax.ShapeDtypeStruct((M, d_model), out_dtype),
        grid_spec=pltpu.PrefetchScalarGridSpec(
            num_scalar_prefetch=0,
            grid=grid,
            in_specs=[
                pl.BlockSpec((tm, D_in), lambda i, j: (i, 0)),   # resid rows
                pl.BlockSpec((tm, D_in), lambda i, j: (i, 0)),   # x rows
                pl.BlockSpec((D_in, tn), lambda i, j: (0, j)),   # weight (bf16)
                pl.BlockSpec((1, tn), lambda i, j: (0, j)),      # bias (f32)
            ],
            out_specs=pl.BlockSpec((tm, tn), lambda i, j: (i, j)),
            scratch_shapes=[pltpu.VMEM((tm, D_in), jnp.bfloat16)],  # gate scratch
        ),
        compiler_params=pltpu.CompilerParams(
            # N axis must stay "arbitrary": the gate scratch is written at
            # j == 0 and reused for j > 0 (serial dependence along N).
            dimension_semantics=("parallel", "arbitrary"),
            vmem_limit_bytes=vmem_limit,
        ),
    )(resid2d, x2d, w, b2d)

    return out2d.reshape(B, S, d_model)


def gal_reference_f32(resid, x, w, b):
    h = jax.nn.sigmoid(resid) * resid + x
    return jnp.einsum("bsd,de->bse", h, w) + b


def gal_reference_bf16(resid, x, w, b):
    # Matches the kernel's numerics: bf16 operands, f32 accumulation.
    h = (jax.nn.sigmoid(resid) * resid + x).astype(jnp.bfloat16).astype(jnp.float32)
    wb = w.astype(jnp.bfloat16).astype(jnp.float32)
    return jnp.einsum("bsd,de->bse", h, wb,
                      preferred_element_type=jnp.float32) + b


if __name__ == "__main__":
    # Small shapes consistent with the module: (batch, seq, hidden), d_model = hidden.
    B, S, D_in = 2, 8, 32
    d_model = 32

    key = jax.random.PRNGKey(0)
    k_resid, k_x, k_w, k_b = jax.random.split(key, 4)

    resid = jax.random.normal(k_resid, (B, S, D_in), dtype=jnp.float32)
    x = jax.random.normal(k_x, (B, S, D_in), dtype=jnp.float32)

    # Deterministic Linear init (PyTorch-style uniform(-1/sqrt(fan_in), 1/sqrt(fan_in))).
    bound = 1.0 / jnp.sqrt(jnp.float32(D_in))
    w = jax.random.uniform(k_w, (D_in, d_model), jnp.float32, -bound, bound)
    b = jax.random.uniform(k_b, (d_model,), jnp.float32, -bound, bound)

    # One-time parameter prep (bf16 weight) -- not repeated per forward call.
    w_prep, b_prep = prepare_gal_params(w, b)

    out = gal_forward(resid, x, w_prep, b_prep)
    jax.block_until_ready(out)

    ref_bf16 = gal_reference_bf16(resid, x, w, b)
    ref_f32 = gal_reference_f32(resid, x, w, b)

    assert out.shape == (B, S, d_model)
    # Tight check against a reference with matching bf16-operand / f32-acc numerics.
    assert jnp.allclose(out, ref_bf16, atol=1e-3, rtol=1e-3)
    # Looser sanity check against the pure f32 reference.
    assert jnp.allclose(out, ref_f32, atol=5e-2, rtol=5e-2)

    print("KERNEL_OK")
</pallas_src>

<mosaic_0001>
module attributes {stable_mosaic.version = 11 : i64} {
  func.func @_gal_kernel(%arg0: i32, %arg1: i32, %arg2: memref<16x32xf32, #tpu.memory_space<vmem>>, %arg3: memref<16x32xf32, #tpu.memory_space<vmem>>, %arg4: memref<32x32xbf16, #tpu.memory_space<vmem>>, %arg5: memref<1x32xf32, #tpu.memory_space<vmem>>, %arg6: memref<16x32xf32, #tpu.memory_space<vmem>>, %arg7: memref<16x32xbf16, #tpu.memory_space<vmem>>) attributes {dimension_semantics = [#tpu.dimension_semantics<parallel>, #tpu.dimension_semantics<arbitrary>], iteration_bounds = array<i64: 1, 1>, scalar_prefetch = 0 : i64, scratch_operands = 1 : i64, tpu.core_type = #tpu.core_type<tc>, window_params = [{transform_indices = @transform_0, window_bounds = array<i64: 16, 32>}, {transform_indices = @transform_1, window_bounds = array<i64: 16, 32>}, {transform_indices = @transform_2, window_bounds = array<i64: 32, 32>}, {transform_indices = @transform_3, window_bounds = array<i64: 1, 32>}, {transform_indices = @transform_4, window_bounds = array<i64: 16, 32>}]} {
    %c0_i32 = arith.constant 0 : i32
    %0 = arith.cmpi eq, %arg1, %c0_i32 : i32
    %1 = arith.extui %0 : i1 to i32
    %c0_i32_0 = arith.constant 0 : i32
    %2 = arith.cmpi ne, %1, %c0_i32_0 : i32
    scf.if %2 {
      %c0_8 = arith.constant 0 : index
      %c0_9 = arith.constant 0 : index
      %10 = vector.load %arg2[%c0_8, %c0_9] : memref<16x32xf32, #tpu.memory_space<vmem>>, vector<16x32xf32>
      %c0_10 = arith.constant 0 : index
      %c0_11 = arith.constant 0 : index
      %11 = vector.load %arg3[%c0_10, %c0_11] : memref<16x32xf32, #tpu.memory_space<vmem>>, vector<16x32xf32>
      %12 = arith.negf %10 : vector<16x32xf32>
      %13 = math.exp %12 : vector<16x32xf32>
      %cst_12 = arith.constant 1.000000e+00 : f32
      %14 = vector.broadcast %cst_12 : f32 to vector<16x32xf32>
      %15 = arith.addf %14, %13 : vector<16x32xf32>
      %16 = arith.divf %14, %15 : vector<16x32xf32>
      %17 = arith.mulf %16, %10 : vector<16x32xf32>
      %18 = arith.addf %17, %11 : vector<16x32xf32>
      %19 = arith.truncf %18 : vector<16x32xf32> to vector<16x32xbf16>
      %c0_13 = arith.constant 0 : index
      %c0_14 = arith.constant 0 : index
      %20 = vector.load %arg7[%c0_13, %c0_14] : memref<16x32xbf16, #tpu.memory_space<vmem>>, vector<16x32xbf16>
      tpu.vector_store %arg7[%c0_13, %c0_14], %19 {strides = array<i32>} : memref<16x32xbf16, #tpu.memory_space<vmem>>, vector<16x32xbf16>,
    } else {
    }
    %c0 = arith.constant 0 : index
    %c0_1 = arith.constant 0 : index
    %3 = vector.load %arg7[%c0, %c0_1] : memref<16x32xbf16, #tpu.memory_space<vmem>>, vector<16x32xbf16>
    %c0_2 = arith.constant 0 : index
    %c0_3 = arith.constant 0 : index
    %4 = vector.load %arg4[%c0_2, %c0_3] : memref<32x32xbf16, #tpu.memory_space<vmem>>, vector<32x32xbf16>
    %cst = arith.constant dense<0.000000e+00> : vector<16x32xf32>
    %5 = tpu.matmul %3, %4, %cst {dimension_numbers = #tpu.dot_dimension_numbers<[1], [0], [0], [1], [0, 0, 1, 1], [], []>} : vector<16x32xbf16>, vector<32x32xbf16>, vector<16x32xf32> -> vector<16x32xf32>
    %c0_4 = arith.constant 0 : index
    %c0_5 = arith.constant 0 : index
    %6 = vector.load %arg5[%c0_4, %c0_5] : memref<1x32xf32, #tpu.memory_space<vmem>>, vector<1x32xf32>
    %7 = vector.broadcast %6 : vector<1x32xf32> to vector<16x32xf32>
    %8 = arith.addf %5, %7 : vector<16x32xf32>
    %c0_6 = arith.constant 0 : index
    %c0_7 = arith.constant 0 : index
    %9 = vector.load %arg6[%c0_6, %c0_7] : memref<16x32xf32, #tpu.memory_space<vmem>>, vector<16x32xf32>
    tpu.vector_store %arg6[%c0_6, %c0_7], %8 {strides = array<i32>} : memref<16x32xf32, #tpu.memory_space<vmem>>, vector<16x32xf32>,
    return
  }
  func.func @transform_0(%arg0: i32, %arg1: i32) -> (i32, i32) {
    %c0_i32 = arith.constant 0 : i32
    %c0_i32_0 = arith.constant 0 : i32
    return %arg0, %c0_i32 : i32, i32
  }
  func.func @transform_1(%arg0: i32, %arg1: i32) -> (i32, i32) {
    %c0_i32 = arith.constant 0 : i32
    %c0_i32_0 = arith.constant 0 : i32
    return %arg0, %c0_i32 : i32, i32
  }
  func.func @transform_2(%arg0: i32, %arg1: i32) -> (i32, i32) {
    %c0_i32 = arith.constant 0 : i32
    %c0_i32_0 = arith.constant 0 : i32
    return %c0_i32, %arg1 : i32, i32
  }
  func.func @transform_3(%arg0: i32, %arg1: i32) -> (i32, i32) {
    %c0_i32 = arith.constant 0 : i32
    %c0_i32_0 = arith.constant 0 : i32
    return %c0_i32, %arg1 : i32, i32
  }
  func.func @transform_4(%arg0: i32, %arg1: i32) -> (i32, i32) {
    %c0_i32 = arith.constant 0 : i32
    return %arg0, %arg1 : i32, i32
  }
}

</mosaic_0001>

<bundles_post_ra>
// kernel: gal_forward.1
= control target key start
LH: loop header
LB: loop body
LE: loop exit
PB: predicated region body
PF: predicated region fallthrough
CT: control target
= control target key end

     0   :  { %9 = vsyncpa [#allocation4], 0  ;;  %s413_s0 = inlined_call_operand.hbm [shape: f32[16,32], index: 0, kind: input, shape index: {}]   ;;  %s414_s1 = inlined_call_operand.hbm [shape: f32[16,32], index: 1, kind: input, shape index: {}]   ;;  %s415_s2 = inlined_call_operand.hbm [shape: bf16[32,32], index: 2, kind: input, shape index: {}]   ;;  %s416_s3 = inlined_call_operand.vmem [shape: f32[1,32], index: 3, kind: input, shape index: {}]   ;;  %s417_s4 = inlined_call_operand.hbm [shape: f32[16,32], index: 4, kind: output, shape index: {}]  }
   0x1   :  { %10 = vsyncpa [#allocation7], 0 }
   0x2   :  { %11 = vsyncpa [#allocation5], 0  ;;  %s307_s15 = smov [#allocation6]   ;;  %s308_s17 = smov [#allocation3]  }
   0x3   :  { %s29_s16 = sshll.u32 %s307_s15, 4  ;;  %s17_s18 = sshll.u32 %s308_s17, 4  ;;  %s30_s16 = int_to_ptr.vmem [resolvable:$true] %s29_s16  ;;  %s342_s18 = int_to_ptr.vmem [resolvable:$true] %s17_s18 }
   0x4   :  { %s213_s21 = scalar_lea.hbm %s414_s1, 256 }
   0x5   :  { %p214_p0 = scmp.ne.s32.totalorder %s414_s1, %s213_s21  ;;  %p217_p1 = scmp.lt.u32.totalorder %s213_s21, %s414_s1 }
   0x7   :  { %p219_p2 = pnand %p217_p1, %p214_p0 }
   0x9   :  { %222 = shalt.err (!%p219_p2)
}
   0xa   :  { %s223_s26 = scalar_lea.vmem %s30_s16, 256  ;;  %p228_p4 = scmp.lt.s32.totalorder %s30_s16, %s30_s16 }
   0xb   :  { %p224_p3 = scmp.ne.s32.totalorder %s30_s16, %s223_s26  ;;  %p229_p5 = scmp.lt.s32.totalorder %s223_s26, %s223_s26 }
   0xd   :  { %p230_p6 = por %p229_p5, %p228_p4 }
   0xf   :  { %p231_p7 = pnand %p230_p6, %p224_p3 }
  0x11   :  { %234 = shalt.err (!%p231_p7)
}
  0x12   :  { %s309_s27 = smov 128   ;;  %s310_s28 = smov 8  }
  0x13   :  { %35 = dma.hbm_to_vmem [thread:$0]  %s414_s1, 256, %s30_s16, [#allocation7], %s309_s27, %s309_s27, %s310_s28  }
  0x14   :  { %s235_s7 = scalar_lea.hbm %s413_s0, 256 }
  0x15   :  { %p236_p8 = scmp.ne.s32.totalorder %s413_s0, %s235_s7  ;;  %p239_p9 = scmp.lt.u32.totalorder %s235_s7, %s413_s0 }
  0x17   :  { %p241_p10 = pnand %p239_p9, %p236_p8 }
  0x19   :  { %244 = shalt.err (!%p241_p10)
}
  0x1a   :  { %s245_s12 = scalar_lea.vmem %s342_s18, 256  ;;  %p250_p12 = scmp.lt.s32.totalorder %s342_s18, %s342_s18 }
  0x1b   :  { %p246_p11 = scmp.ne.s32.totalorder %s342_s18, %s245_s12  ;;  %p251_p13 = scmp.lt.s32.totalorder %s245_s12, %s245_s12 }
  0x1d   :  { %p252_p0 = por %p251_p13, %p250_p12 }
  0x1f   :  { %p253_p1 = pnand %p252_p0, %p246_p11 }
  0x21   :  { %256 = shalt.err (!%p253_p1)
}
  0x22   :  { %23 = dma.hbm_to_vmem [thread:$0]  %s413_s0, 256, %s342_s18, [#allocation4], %s309_s27, %s309_s27, %s310_s28  }
  0x23   :  { %s311_s14 = smov [#allocation8]   ;;  %s257_s19 = scalar_lea.hbm %s415_s2, 256 }
  0x24   :  { %s41_s15 = sshll.u32 %s311_s14, 4  ;;  %p258_p2 = scmp.ne.s32.totalorder %s415_s2, %s257_s19  ;;  %s42_s15 = int_to_ptr.vmem [resolvable:$true] %s41_s15 }
  0x25   :  { %p261_p3 = scmp.lt.u32.totalorder %s257_s19, %s415_s2 }
  0x27   :  { %p263_p4 = pnand %p261_p3, %p258_p2 }
  0x29   :  { %266 = shalt.err (!%p263_p4)
}
  0x2a   :  { %s267_s24 = scalar_lea.vmem %s42_s15, 256  ;;  %p272_p6 = scmp.lt.s32.totalorder %s42_s15, %s42_s15 }
  0x2b   :  { %p268_p5 = scmp.ne.s32.totalorder %s42_s15, %s267_s24  ;;  %p273_p7 = scmp.lt.s32.totalorder %s267_s24, %s267_s24 }
  0x2d   :  { %p274_p8 = por %p273_p7, %p272_p6 }
  0x2f   :  { %p275_p9 = pnand %p274_p8, %p268_p5 }
  0x31   :  { %278 = shalt.err (!%p275_p9)
}
  0x32   :  { %s312_s0 = smov 64   ;;  %s313_s18 = smov 4  }
  0x33   :  { %47 = dma.hbm_to_vmem [thread:$0]  %s415_s2, 256, %s42_s15, [#allocation7], %s312_s0, %s312_s0, %s313_s18  }
  0x34   :  { %301 = dma.done.wait [#allocation4], 256  }
  0x35   :  { %302 = vsyncadd [#allocation4], 4294967040 }
  0x36   :  { %303 = dma.done.wait [#allocation7], 512  }
  0x37   :  { %304 = vsyncadd [#allocation7], 4294966784  ;;  %v314_v0 = vmov 0.0   ;;  %vm315_vm0 = vmmov 0   ;;  %v203_v1 = vld [vmem:[#allocation8] sm:$0xff]   ;;  %v204_v2 = vld [vmem:[#allocation8 + $0x8] sm:$0xff]  }
  0x38   :  { %185 = vmatprep.subr.bf16.mxu0 %v314_v0  ;;  %189 = vmatprep.mubr.msk.bf16.mxu0 %vm315_vm0, %v314_v0  ;;  %v64_v3 = vld [vmem:[#allocation3] sm:$0xff]  ;;  %v65_v4 = vld [vmem:[#allocation3 + $0x8] sm:$0xff]  ;;  %v66_v12 = vld [vmem:[#allocation6] sm:$0xff]  ;;  %vm85_vm1 = vcmask 261120   ;;  %s316_s30 = smov [#allocation9]  }
  0x39   :  { %186 = vmatpush3.bf16.msra.mxu0 %v203_v1  ;;  %v176_v5 = vmul.f32 -1.442695, %v64_v3  ;;  %v177_v6 = vmul.f32 -1.442695, %v65_v4  ;;  %v67_v14 = vld [vmem:[#allocation6 + $0x8] sm:$0xff]  ;;  %s163_s5 = sshll.u32 %s316_s30, 4  ;;  %s164_s5 = int_to_ptr.vmem [resolvable:$true] %s163_s5 }
  0x3a   :  { %187 = vmatprep.subr.bf16.mxu0 %v314_v0  ;;  %v178_v21 = vld [vmem:[%s416_s3] ss:$0 sm:$0xff]  ;;  %s279_s6 = scalar_lea.vmem %s164_s5, 256  ;;  %p284_p11 = scmp.lt.s32.totalorder %s164_s5, %s164_s5 }
  0x3b   :  { %205 = vpow2.f32 %v176_v5  ;;  %p280_p10 = scmp.ne.s32.totalorder %s164_s5, %s279_s6  ;;  %p285_p12 = scmp.lt.s32.totalorder %s279_s6, %s279_s6 }
  0x3c   :  { %207 = vpow2.f32 %v177_v6 }
  0x3d   :  { %188 = vmatpush3.bf16.msra.mxu0 %v204_v2  ;;  %p286_p13 = por %p285_p12, %p284_p11 }
  0x3f   :  { %p287_p0 = pnand %p286_p13, %p280_p10 }
  0x45   :  { %v206_v7 = vpop.eup %205 }
  0x46   :  { %v208_v8 = vpop.eup %207  ;;  %v74_v9 = vadd.f32 1.0, %v206_v7 }
  0x47   :  { %v75_v10 = vadd.f32 1.0, %v208_v8 }
  0x48   :  { %209 = vrcp.f32 %v74_v9 }
  0x49   :  { %211 = vrcp.f32 %v75_v10 }
  0x52   :  { %v210_v11 = vpop.eup %209 }
  0x53   :  { %v212_v13 = vpop.eup %211  ;;  %v80_v15 = vmul.f32 %v210_v11, %v64_v3 }
  0x54   :  { %v81_v16 = vmul.f32 %v212_v13, %v65_v4 }
  0x55   :  { %v82_v17 = vadd.f32 %v80_v15, %v66_v12 }
  0x56   :  { %v83_v18 = vadd.f32 %v81_v16, %v67_v14 }
  0x58   :  { %v84_v19 = vpack.c.bf16 %v83_v18, %v82_v17 }
  0x5a   :  { %86 = vst.msk [vmem:[#allocation2] sm:$0xff] %vm85_vm1, %v84_v19 }
  0x61   :  { %v87_v20 = vld [vmem:[#allocation2] sm:$0xff] }
  0x62   :  { %190 = vmatmul.mubr.msk.bf16.vlgmr.msra.gmra.mrb[0].mxu0 %vm85_vm1, %v87_v20 }
 0x135   :  { %v149_v22 = vpop.f32.mrb[0].mxu0 }
 0x136   :  { %v150_v23 = vadd.f32 %v178_v21, %v149_v22  ;;  %v191_v24 = vpop.f32.mrb[1].mxu0 }
 0x137   :  { %v152_v25 = vpop.f32.mrb[2].mxu0 }
 0x138   :  { %156 = vst.msk [vmem:[#allocation9] sm:$0xff] %vm85_vm1, %v150_v23  ;;  %v153_v26 = vadd.f32 %v178_v21, %v152_v25  ;;  %v192_v27 = vpop.f32.mrb[3].mxu0 }
 0x13a   :  { %157 = vst.msk [vmem:[#allocation9 + $0x8] sm:$0xff] %vm85_vm1, %v153_v26 }
 0x13b   :  { %290 = shalt.err (!%p287_p0)
}
 0x13c   :  { %s291_s8 = scalar_lea.hbm %s417_s4, 256 }
 0x13d   :  { %p292_p1 = scmp.ne.s32.totalorder %s417_s4, %s291_s8  ;;  %p295_p2 = scmp.lt.u32.totalorder %s291_s8, %s417_s4 }
 0x13f   :  { %p297_p3 = pnand %p295_p2, %p292_p1 }
 0x141   :  { %300 = shalt.err (!%p297_p3)
}
 0x142   :  { %169 = dma.vmem_to_hbm [thread:$0]  %s164_s5, 256, %s417_s4, [#allocation5], %s309_s27, %s309_s27, %s310_s28  }
 0x143   :  { %305 = dma.done.wait [#allocation5], 256  }
 0x144   :  { %306 = vsyncadd [#allocation5], 4294967040 }
 0x145   :  { %173 = vsyncpa [#allocation4], 1 }
 0x146   :  { %174 = vsyncpa [#allocation7], 1 }
 0x147   :  { %175 = vsyncpa [#allocation5], 1 }

</bundles_post_ra>
